<compile_context>
chip_gen: v6e
topology: v6e:2x2x1
jax: 0.10.0
libtpu: 0.0.40
codegen_flags: <defaults>
</compile_context>

<pallas_src>
import math
import functools

import jax
import jax.numpy as jnp
from jax.experimental import pallas as pl
from jax.experimental.pallas import tpu as pltpu


def _transform_kernel(x_ref, w_ref, b_ref, gamma_ref, beta_ref, o_ref, *,
                      eps, gelu_dtype, matmul_dtype):
    x = x_ref[...]
    if matmul_dtype is not None and x.dtype != matmul_dtype:
        x = x.astype(matmul_dtype)

    # Dense: [TM, H] @ [H, H] on the MXU, f32 accumulation.
    h = jnp.dot(x, w_ref[...], preferred_element_type=jnp.float32)
    h = h + b_ref[...]                       # bias kept f32

    # GELU (tanh approximation) with the leading 0.5 dropped: the LayerNorm
    # immediately after is invariant to a positive scale of its input, and the
    # eps below is scaled by 4 so the result is exactly equivalent.
    #   g = 2*gelu(h) = h*(1 + tanh(c*h*(1 + 0.044715*h^2)))
    # tanh lands on the EUP (separate issue slot).  Polynomial runs in the
    # activation dtype (bf16 on v6e/v7x -> 2x packed VALU throughput).
    hg = h.astype(gelu_dtype)
    c = math.sqrt(2.0 / math.pi)
    g = hg * (1.0 + jnp.tanh((c * hg) * (1.0 + 0.044715 * (hg * hg))))
    g = g.astype(jnp.float32)

    # LayerNorm (TF style: eps inside the sqrt, biased variance), stats in f32.
    # Input here is 2x the reference pre-LN value -> use 4*eps (exact).
    u = jnp.mean(g, axis=-1, keepdims=True)
    d = g - u
    s = jnp.mean(d * d, axis=-1, keepdims=True)
    normed = d * jax.lax.rsqrt(s + 4.0 * eps)          # rsqrt -> EUP
    o_ref[...] = (gamma_ref[...] * normed + beta_ref[...]).astype(o_ref.dtype)


def _round_up(x, m):
    return (x + m - 1) // m * m


def bert_prediction_head_transform(hidden_states, w, b, gamma, beta,
                                   *, eps=1e-12, tile_m=512, matmul_dtype=None):
    """hidden_states: [B, S, H]; w: [H, H] (input-major, i.e. torch weight.T);
    b, gamma, beta: [H].  matmul_dtype=jnp.bfloat16 runs the dense layer in
    bf16 (f32 accumulation) even for f32 activations (useful on v5e)."""
    B, S, H = hidden_states.shape
    M = B * S
    dtype = hidden_states.dtype

    compute_dtype = jnp.dtype(matmul_dtype) if matmul_dtype is not None else jnp.dtype(dtype)
    gelu_dtype = jnp.bfloat16 if jnp.dtype(dtype) == jnp.bfloat16 else jnp.float32

    w = w.astype(compute_dtype)
    b2d = b.reshape(1, H).astype(jnp.float32)
    g2d = gamma.reshape(1, H).astype(jnp.float32)
    be2d = beta.reshape(1, H).astype(jnp.float32)

    # Sublane packing: 16 rows per vreg for bf16, 8 for f32.
    pack = 16 if jnp.dtype(dtype) == jnp.bfloat16 else 8
    tile_m = max(pack, min(_round_up(tile_m, pack), _round_up(M, pack)))
    # Ensure >= 2 grid steps when possible so both v7x TensorCores get work
    # under dimension_semantics=("parallel",).
    if pl.cdiv(M, tile_m) < 2 and M > pack:
        tile_m = max(pack, _round_up(pl.cdiv(M, 2), pack))
    grid_m = pl.cdiv(M, tile_m)   # ragged last tile handled by Pallas masking

    x2d = hidden_states.reshape(M, H)   # free view; no pad / slice HBM passes

    # VMEM budget: resident single-buffered weight + double-buffered x/out
    # tiles + f32 intermediates of the epilogue, sized per generation.
    x_bytes = jnp.dtype(dtype).itemsize
    w_bytes = jnp.dtype(compute_dtype).itemsize
    need = (H * H * w_bytes                       # weight (single-buffered, resident)
            + 2 * tile_m * H * x_bytes            # x tiles, double-buffered
            + 2 * tile_m * H * x_bytes            # out tiles, double-buffered
            + 3 * tile_m * H * 4                  # f32 matmul result / GELU / LN temps
            + 16 * H * 4                          # bias / gamma / beta blocks
            + (2 << 20))                          # misc margin
    try:
        info = pltpu.get_tpu_info()
        vmem_phys = int(getattr(info, "vmem_capacity_bytes", 0)) or (64 << 20)
    except Exception:                             # not on real TPU / interpret mode
        vmem_phys = 64 << 20                      # conservative (v7x per-TC VMEM)
    vmem_cap = int(vmem_phys * 7 // 8)            # ~87.5% of physical
    if need > vmem_cap:
        # TODO(synk): add an output-column grid axis (two-pass LN) once the
        # full [H, H] weight no longer fits resident in VMEM.
        raise ValueError(
            f"kernel needs ~{need >> 20} MiB VMEM but only ~{vmem_cap >> 20} MiB "
            f"is available on this chip; reduce tile_m or tile the output dim")
    vmem_limit = int(min(max(need, 32 << 20), vmem_cap))

    kernel = functools.partial(
        _transform_kernel, eps=float(eps), gelu_dtype=gelu_dtype,
        matmul_dtype=(compute_dtype if matmul_dtype is not None else None))

    def _call(single_buffer_invariants):
        kw = dict(pipeline_mode=pl.Buffered(1)) if single_buffer_invariants else {}
        const = lambda i: (0, 0)
        in_specs = [
            pl.BlockSpec((tile_m, H), lambda i: (i, 0)),   # x tile (pipelined)
            # Grid-invariant operands: constant block index -> stay resident
            # across grid steps; single buffer (no wasted 2nd H x H copy).
            pl.BlockSpec((H, H), const, **kw),             # dense weight
            pl.BlockSpec((1, H), const, **kw),             # dense bias (f32)
            pl.BlockSpec((1, H), const, **kw),             # LN gamma (f32)
            pl.BlockSpec((1, H), const, **kw),             # LN beta  (f32)
        ]
        out_specs = pl.BlockSpec((tile_m, H), lambda i: (i, 0))
        return pl.pallas_call(
            kernel,
            out_shape=jax.ShapeDtypeStruct((M, H), dtype),
            grid_spec=pltpu.PrefetchScalarGridSpec(
                num_scalar_prefetch=0,
                grid=(grid_m,),
                in_specs=in_specs,
                out_specs=out_specs),
            compiler_params=pltpu.CompilerParams(
                dimension_semantics=("parallel",),
                vmem_limit_bytes=vmem_limit),
        )(x2d, w, b2d, g2d, be2d)

    try:
        out = _call(True)
    except Exception:
        # Fallback for JAX builds that reject pipeline_mode=pl.Buffered(1);
        # identical semantics, just default double-buffering of the invariants.
        out = _call(False)

    return out.reshape(B, S, H)


def _reference(hidden_states, w, b, gamma, beta, eps=1e-12):
    h = jnp.einsum("bsh,hk->bsk", hidden_states.astype(jnp.float32),
                   w.astype(jnp.float32)) + b
    c = math.sqrt(2.0 / math.pi)
    h = 0.5 * h * (1.0 + jnp.tanh(c * (h + 0.044715 * h ** 3)))
    u = jnp.mean(h, axis=-1, keepdims=True)
    s = jnp.mean((h - u) ** 2, axis=-1, keepdims=True)
    h = (h - u) / jnp.sqrt(s + eps)
    return gamma * h + beta


if __name__ == "__main__":
    # Small shapes consistent with the module: batch=2, seq=8, hidden=32.
    B, S, H = 2, 8, 32
    key = jax.random.PRNGKey(0)
    k_x, k_w, k_b = jax.random.split(key, 3)

    x = jax.random.normal(k_x, (B, S, H), dtype=jnp.float32)
    # Deterministic parameter init (synthetic; shapes from nn.Linear(H, H) and LayerNorm(H)).
    w = jax.random.normal(k_w, (H, H), dtype=jnp.float32) * (1.0 / math.sqrt(H))
    b = jax.random.normal(k_b, (H,), dtype=jnp.float32) * 0.02
    gamma = jnp.ones((H,), dtype=jnp.float32)   # LayerNorm.weight init = ones
    beta = jnp.zeros((H,), dtype=jnp.float32)   # LayerNorm.bias init = zeros

    out = jax.block_until_ready(bert_prediction_head_transform(x, w, b, gamma, beta))
    ref = _reference(x, w, b, gamma, beta)
    assert out.shape == (B, S, H)
    assert jnp.allclose(out, ref, atol=1e-4, rtol=1e-4), "mismatch vs reference (f32)"

    # Second check: M not divisible by the tile -> exercises the ragged last
    # tile (masked partial block, no wrapper-side pad/slice).
    B2, S2, H2 = 3, 5, 128
    k_x2, k_w2, k_b2 = jax.random.split(jax.random.PRNGKey(1), 3)
    x2 = jax.random.normal(k_x2, (B2, S2, H2), dtype=jnp.float32)
    w2 = jax.random.normal(k_w2, (H2, H2), dtype=jnp.float32) * (1.0 / math.sqrt(H2))
    b2 = jax.random.normal(k_b2, (H2,), dtype=jnp.float32) * 0.02
    g2 = jnp.ones((H2,), dtype=jnp.float32)
    be2 = jnp.zeros((H2,), dtype=jnp.float32)

    out2 = jax.block_until_ready(
        bert_prediction_head_transform(x2, w2, b2, g2, be2))
    ref2 = _reference(x2, w2, b2, g2, be2)
    assert out2.shape == (B2, S2, H2)
    assert jnp.allclose(out2, ref2, atol=2e-4, rtol=2e-4), "mismatch vs reference (ragged)"

    # TODO(synk): this is the tanh-approx GELU (as in the given PyTorch spec);
    # stock HF BERT with hidden_act='gelu' (erf) would differ by ~1e-3.
    print("KERNEL_OK")
</pallas_src>

<mosaic_0001>
module attributes {stable_mosaic.version = 11 : i64} {
  func.func @_transform_kernel(%arg0: i32, %arg1: memref<8x32xf32, #tpu.memory_space<vmem>>, %arg2: memref<32x32xf32, #tpu.memory_space<vmem>>, %arg3: memref<1x32xf32, #tpu.memory_space<vmem>>, %arg4: memref<1x32xf32, #tpu.memory_space<vmem>>, %arg5: memref<1x32xf32, #tpu.memory_space<vmem>>, %arg6: memref<8x32xf32, #tpu.memory_space<vmem>>) attributes {dimension_semantics = [#tpu.dimension_semantics<parallel>], iteration_bounds = array<i64: 2>, scalar_prefetch = 0 : i64, scratch_operands = 0 : i64, tpu.core_type = #tpu.core_type<tc>, window_params = [{transform_indices = @transform_0, window_bounds = array<i64: 8, 32>}, {pipeline_mode = #tpu.pipeline_mode<synchronous>, transform_indices = @transform_1, window_bounds = array<i64: 32, 32>}, {pipeline_mode = #tpu.pipeline_mode<synchronous>, transform_indices = @transform_2, window_bounds = array<i64: 1, 32>}, {pipeline_mode = #tpu.pipeline_mode<synchronous>, transform_indices = @transform_3, window_bounds = array<i64: 1, 32>}, {pipeline_mode = #tpu.pipeline_mode<synchronous>, transform_indices = @transform_4, window_bounds = array<i64: 1, 32>}, {transform_indices = @transform_5, window_bounds = array<i64: 8, 32>}]} {
    %c0 = arith.constant 0 : index
    %c0_0 = arith.constant 0 : index
    %0 = vector.load %arg1[%c0, %c0_0] : memref<8x32xf32, #tpu.memory_space<vmem>>, vector<8x32xf32>
    %c0_1 = arith.constant 0 : index
    %c0_2 = arith.constant 0 : index
    %1 = vector.load %arg2[%c0_1, %c0_2] : memref<32x32xf32, #tpu.memory_space<vmem>>, vector<32x32xf32>
    %cst = arith.constant dense<0.000000e+00> : vector<8x32xf32>
    %2 = tpu.matmul %0, %1, %cst {dimension_numbers = #tpu.dot_dimension_numbers<[1], [0], [0], [1], [0, 0, 1, 1], [], []>} : vector<8x32xf32>, vector<32x32xf32>, vector<8x32xf32> -> vector<8x32xf32>
    %c0_3 = arith.constant 0 : index
    %c0_4 = arith.constant 0 : index
    %3 = vector.load %arg3[%c0_3, %c0_4] : memref<1x32xf32, #tpu.memory_space<vmem>>, vector<1x32xf32>
    %4 = vector.broadcast %3 : vector<1x32xf32> to vector<8x32xf32>
    %5 = arith.addf %2, %4 : vector<8x32xf32>
    %cst_5 = arith.constant 0.797884583 : f32
    %6 = vector.broadcast %cst_5 : f32 to vector<8x32xf32>
    %7 = arith.mulf %6, %5 : vector<8x32xf32>
    %8 = arith.mulf %5, %5 : vector<8x32xf32>
    %cst_6 = arith.constant 4.471500e-02 : f32
    %9 = vector.broadcast %cst_6 : f32 to vector<8x32xf32>
    %10 = arith.mulf %9, %8 : vector<8x32xf32>
    %cst_7 = arith.constant 1.000000e+00 : f32
    %11 = vector.broadcast %cst_7 : f32 to vector<8x32xf32>
    %12 = arith.addf %11, %10 : vector<8x32xf32>
    %13 = arith.mulf %7, %12 : vector<8x32xf32>
    %14 = math.tanh %13 : vector<8x32xf32>
    %cst_8 = arith.constant 1.000000e+00 : f32
    %15 = vector.broadcast %cst_8 : f32 to vector<8x32xf32>
    %16 = arith.addf %15, %14 : vector<8x32xf32>
    %17 = arith.mulf %5, %16 : vector<8x32xf32>
    %cst_9 = arith.constant dense<0.000000e+00> : vector<8xf32>
    %18 = vector.multi_reduction <add>, %17, %cst_9 [1] : vector<8x32xf32> to vector<8xf32>
    %19 = vector.shape_cast %18 : vector<8xf32> to vector<8x1xf32>
    %cst_10 = arith.constant 3.200000e+01 : f32
    %20 = vector.broadcast %cst_10 : f32 to vector<8x1xf32>
    %21 = arith.divf %19, %20 : vector<8x1xf32>
    %22 = vector.broadcast %21 : vector<8x1xf32> to vector<8x32xf32>
    %23 = arith.subf %17, %22 : vector<8x32xf32>
    %24 = arith.mulf %23, %23 : vector<8x32xf32>
    %cst_11 = arith.constant dense<0.000000e+00> : vector<8xf32>
    %25 = vector.multi_reduction <add>, %24, %cst_11 [1] : vector<8x32xf32> to vector<8xf32>
    %26 = vector.shape_cast %25 : vector<8xf32> to vector<8x1xf32>
    %cst_12 = arith.constant 3.200000e+01 : f32
    %27 = vector.broadcast %cst_12 : f32 to vector<8x1xf32>
    %28 = arith.divf %26, %27 : vector<8x1xf32>
    %cst_13 = arith.constant 4.000000e-12 : f32
    %29 = vector.broadcast %cst_13 : f32 to vector<8x1xf32>
    %30 = arith.addf %28, %29 : vector<8x1xf32>
    %31 = math.rsqrt %30 : vector<8x1xf32>
    %32 = vector.broadcast %31 : vector<8x1xf32> to vector<8x32xf32>
    %33 = arith.mulf %23, %32 : vector<8x32xf32>
    %c0_14 = arith.constant 0 : index
    %c0_15 = arith.constant 0 : index
    %34 = vector.load %arg4[%c0_14, %c0_15] : memref<1x32xf32, #tpu.memory_space<vmem>>, vector<1x32xf32>
    %35 = vector.broadcast %34 : vector<1x32xf32> to vector<8x32xf32>
    %36 = arith.mulf %35, %33 : vector<8x32xf32>
    %c0_16 = arith.constant 0 : index
    %c0_17 = arith.constant 0 : index
    %37 = vector.load %arg5[%c0_16, %c0_17] : memref<1x32xf32, #tpu.memory_space<vmem>>, vector<1x32xf32>
    %38 = vector.broadcast %37 : vector<1x32xf32> to vector<8x32xf32>
    %39 = arith.addf %36, %38 : vector<8x32xf32>
    %c0_18 = arith.constant 0 : index
    %c0_19 = arith.constant 0 : index
    %40 = vector.load %arg6[%c0_18, %c0_19] : memref<8x32xf32, #tpu.memory_space<vmem>>, vector<8x32xf32>
    tpu.vector_store %arg6[%c0_18, %c0_19], %39 {strides = array<i32>} : memref<8x32xf32, #tpu.memory_space<vmem>>, vector<8x32xf32>,
    return
  }
  func.func @transform_0(%arg0: i32) -> (i32, i32) {
    %c0_i32 = arith.constant 0 : i32
    %c0_i32_0 = arith.constant 0 : i32
    return %arg0, %c0_i32 : i32, i32
  }
  func.func @transform_1(%arg0: i32) -> (i32, i32) {
    %c0_i32 = arith.constant 0 : i32
    %c0_i32_0 = arith.constant 0 : i32
    %c0_i32_1 = arith.constant 0 : i32
    return %c0_i32, %c0_i32_0 : i32, i32
  }
  func.func @transform_2(%arg0: i32) -> (i32, i32) {
    %c0_i32 = arith.constant 0 : i32
    %c0_i32_0 = arith.constant 0 : i32
    %c0_i32_1 = arith.constant 0 : i32
    return %c0_i32, %c0_i32_0 : i32, i32
  }
  func.func @transform_3(%arg0: i32) -> (i32, i32) {
    %c0_i32 = arith.constant 0 : i32
    %c0_i32_0 = arith.constant 0 : i32
    %c0_i32_1 = arith.constant 0 : i32
    return %c0_i32, %c0_i32_0 : i32, i32
  }
  func.func @transform_4(%arg0: i32) -> (i32, i32) {
    %c0_i32 = arith.constant 0 : i32
    %c0_i32_0 = arith.constant 0 : i32
    %c0_i32_1 = arith.constant 0 : i32
    return %c0_i32, %c0_i32_0 : i32, i32
  }
  func.func @transform_5(%arg0: i32) -> (i32, i32) {
    %c0_i32 = arith.constant 0 : i32
    %c0_i32_0 = arith.constant 0 : i32
    return %arg0, %c0_i32 : i32, i32
  }
}

module attributes {stable_mosaic.version = 11 : i64} {
  func.func @_transform_kernel(%arg0: i32, %arg1: memref<8x32xf32, #tpu.memory_space<vmem>>, %arg2: memref<32x32xf32, #tpu.memory_space<vmem>>, %arg3: memref<1x32xf32, #tpu.memory_space<vmem>>, %arg4: memref<1x32xf32, #tpu.memory_space<vmem>>, %arg5: memref<1x32xf32, #tpu.memory_space<vmem>>, %arg6: memref<8x32xf32, #tpu.memory_space<vmem>>) attributes {dimension_semantics = [#tpu.dimension_semantics<parallel>], iteration_bounds = array<i64: 2>, scalar_prefetch = 0 : i64, scratch_operands = 0 : i64, tpu.core_type = #tpu.core_type<tc>, window_params = [{transform_indices = @transform_0, window_bounds = array<i64: 8, 32>}, {pipeline_mode = #tpu.pipeline_mode<synchronous>, transform_indices = @transform_1, window_bounds = array<i64: 32, 32>}, {pipeline_mode = #tpu.pipeline_mode<synchronous>, transform_indices = @transform_2, window_bounds = array<i64: 1, 32>}, {pipeline_mode = #tpu.pipeline_mode<synchronous>, transform_indices = @transform_3, window_bounds = array<i64: 1, 32>}, {pipeline_mode = #tpu.pipeline_mode<synchronous>, transform_indices = @transform_4, window_bounds = array<i64: 1, 32>}, {transform_indices = @transform_5, window_bounds = array<i64: 8, 32>}]} {
    %c0 = arith.constant 0 : index
    %c0_0 = arith.constant 0 : index
    %0 = vector.load %arg1[%c0, %c0_0] : memref<8x32xf32, #tpu.memory_space<vmem>>, vector<8x32xf32>
    %c0_1 = arith.constant 0 : index
    %c0_2 = arith.constant 0 : index
    %1 = vector.load %arg2[%c0_1, %c0_2] : memref<32x32xf32, #tpu.memory_space<vmem>>, vector<32x32xf32>
    %cst = arith.constant dense<0.000000e+00> : vector<8x32xf32>
    %2 = tpu.matmul %0, %1, %cst {dimension_numbers = #tpu.dot_dimension_numbers<[1], [0], [0], [1], [0, 0, 1, 1], [], []>} : vector<8x32xf32>, vector<32x32xf32>, vector<8x32xf32> -> vector<8x32xf32>
    %c0_3 = arith.constant 0 : index
    %c0_4 = arith.constant 0 : index
    %3 = vector.load %arg3[%c0_3, %c0_4] : memref<1x32xf32, #tpu.memory_space<vmem>>, vector<1x32xf32>
    %4 = vector.broadcast %3 : vector<1x32xf32> to vector<8x32xf32>
    %5 = arith.addf %2, %4 : vector<8x32xf32>
    %cst_5 = arith.constant 0.797884583 : f32
    %6 = vector.broadcast %cst_5 : f32 to vector<8x32xf32>
    %7 = arith.mulf %6, %5 : vector<8x32xf32>
    %8 = arith.mulf %5, %5 : vector<8x32xf32>
    %cst_6 = arith.constant 4.471500e-02 : f32
    %9 = vector.broadcast %cst_6 : f32 to vector<8x32xf32>
    %10 = arith.mulf %9, %8 : vector<8x32xf32>
    %cst_7 = arith.constant 1.000000e+00 : f32
    %11 = vector.broadcast %cst_7 : f32 to vector<8x32xf32>
    %12 = arith.addf %11, %10 : vector<8x32xf32>
    %13 = arith.mulf %7, %12 : vector<8x32xf32>
    %14 = math.tanh %13 : vector<8x32xf32>
    %cst_8 = arith.constant 1.000000e+00 : f32
    %15 = vector.broadcast %cst_8 : f32 to vector<8x32xf32>
    %16 = arith.addf %15, %14 : vector<8x32xf32>
    %17 = arith.mulf %5, %16 : vector<8x32xf32>
    %cst_9 = arith.constant dense<0.000000e+00> : vector<8xf32>
    %18 = vector.multi_reduction <add>, %17, %cst_9 [1] : vector<8x32xf32> to vector<8xf32>
    %19 = vector.shape_cast %18 : vector<8xf32> to vector<8x1xf32>
    %cst_10 = arith.constant 3.200000e+01 : f32
    %20 = vector.broadcast %cst_10 : f32 to vector<8x1xf32>
    %21 = arith.divf %19, %20 : vector<8x1xf32>
    %22 = vector.broadcast %21 : vector<8x1xf32> to vector<8x32xf32>
    %23 = arith.subf %17, %22 : vector<8x32xf32>
    %24 = arith.mulf %23, %23 : vector<8x32xf32>
    %cst_11 = arith.constant dense<0.000000e+00> : vector<8xf32>
    %25 = vector.multi_reduction <add>, %24, %cst_11 [1] : vector<8x32xf32> to vector<8xf32>
    %26 = vector.shape_cast %25 : vector<8xf32> to vector<8x1xf32>
    %cst_12 = arith.constant 3.200000e+01 : f32
    %27 = vector.broadcast %cst_12 : f32 to vector<8x1xf32>
    %28 = arith.divf %26, %27 : vector<8x1xf32>
    %cst_13 = arith.constant 4.000000e-12 : f32
    %29 = vector.broadcast %cst_13 : f32 to vector<8x1xf32>
    %30 = arith.addf %28, %29 : vector<8x1xf32>
    %31 = math.rsqrt %30 : vector<8x1xf32>
    %32 = vector.broadcast %31 : vector<8x1xf32> to vector<8x32xf32>
    %33 = arith.mulf %23, %32 : vector<8x32xf32>
    %c0_14 = arith.constant 0 : index
    %c0_15 = arith.constant 0 : index
    %34 = vector.load %arg4[%c0_14, %c0_15] : memref<1x32xf32, #tpu.memory_space<vmem>>, vector<1x32xf32>
    %35 = vector.broadcast %34 : vector<1x32xf32> to vector<8x32xf32>
    %36 = arith.mulf %35, %33 : vector<8x32xf32>
    %c0_16 = arith.constant 0 : index
    %c0_17 = arith.constant 0 : index
    %37 = vector.load %arg5[%c0_16, %c0_17] : memref<1x32xf32, #tpu.memory_space<vmem>>, vector<1x32xf32>
    %38 = vector.broadcast %37 : vector<1x32xf32> to vector<8x32xf32>
    %39 = arith.addf %36, %38 : vector<8x32xf32>
    %c0_18 = arith.constant 0 : index
    %c0_19 = arith.constant 0 : index
    %40 = vector.load %arg6[%c0_18, %c0_19] : memref<8x32xf32, #tpu.memory_space<vmem>>, vector<8x32xf32>
    tpu.vector_store %arg6[%c0_18, %c0_19], %39 {strides = array<i32>} : memref<8x32xf32, #tpu.memory_space<vmem>>, vector<8x32xf32>,
    return
  }
  func.func @transform_0(%arg0: i32) -> (i32, i32) {
    %c0_i32 = arith.constant 0 : i32
    %c0_i32_0 = arith.constant 0 : i32
    return %arg0, %c0_i32 : i32, i32
  }
  func.func @transform_1(%arg0: i32) -> (i32, i32) {
    %c0_i32 = arith.constant 0 : i32
    %c0_i32_0 = arith.constant 0 : i32
    %c0_i32_1 = arith.constant 0 : i32
    return %c0_i32, %c0_i32_0 : i32, i32
  }
  func.func @transform_2(%arg0: i32) -> (i32, i32) {
    %c0_i32 = arith.constant 0 : i32
    %c0_i32_0 = arith.constant 0 : i32
    %c0_i32_1 = arith.constant 0 : i32
    return %c0_i32, %c0_i32_0 : i32, i32
  }
  func.func @transform_3(%arg0: i32) -> (i32, i32) {
    %c0_i32 = arith.constant 0 : i32
    %c0_i32_0 = arith.constant 0 : i32
    %c0_i32_1 = arith.constant 0 : i32
    return %c0_i32, %c0_i32_0 : i32, i32
  }
  func.func @transform_4(%arg0: i32) -> (i32, i32) {
    %c0_i32 = arith.constant 0 : i32
    %c0_i32_0 = arith.constant 0 : i32
    %c0_i32_1 = arith.constant 0 : i32
    return %c0_i32, %c0_i32_0 : i32, i32
  }
  func.func @transform_5(%arg0: i32) -> (i32, i32) {
    %c0_i32 = arith.constant 0 : i32
    %c0_i32_0 = arith.constant 0 : i32
    return %arg0, %c0_i32 : i32, i32
  }
}

</mosaic_0001>

<bundles_post_ra>
// kernel: tpu_custom_call.1
= control target key start
LH: loop header
LB: loop body
LE: loop exit
PB: predicated region body
PF: predicated region fallthrough
CT: control target
= control target key end

     0   :  { %10 = vsyncpa [#allocation3], 0  ;;  %s905_s0 = inlined_call_operand.hbm [shape: f32[16,32], index: 0, kind: input, shape index: {}]   ;;  %s906_s1 = inlined_call_operand.hbm [shape: f32[32,32], index: 1, kind: input, shape index: {}]   ;;  %s907_s2 = inlined_call_operand.vmem [shape: f32[1,32], index: 2, kind: input, shape index: {}]   ;;  %s908_s3 = inlined_call_operand.vmem [shape: f32[1,32], index: 3, kind: input, shape index: {}]   ;;  %s909_s4 = inlined_call_operand.vmem [shape: f32[1,32], index: 4, kind: input, shape index: {}]   ;;  %s910_s5 = inlined_call_operand.hbm [shape: f32[16,32], index: 5, kind: output, shape index: {}]  }
   0x1   :  { %12 = vsyncpa [#allocation3 + $0x1], 0 }
   0x2   :  { %13 = vsyncpa [#allocation6], 0 }
   0x3   :  { %14 = vsyncpa [#allocation4], 0 }
   0x4   :  { %16 = vsyncpa [#allocation4 + $0x1], 0  ;;  %s734_s18 = smov 0   ;;  %s736_s19 = smov 0  }
   0x5   :  { %s738_s20 = smov 0   ;;  %s740_s21 = smov 0  }
   0x6 LB: > { %s755_s22 = sadd.s32 4294967295, %s695_s21   ;;  %s474_s23 = sadd.s32 4294967294, %s695_s21   ;;  %s695_s21 = sphi %s740_s21, %s932_s21   ;;  %s691_s20 = sphi %s738_s20, %s931_s20   ;;  %s687_s19 = sphi %s736_s19, %s930_s19   ;;  %s683_s18 = sphi %s734_s18, %s929_s18  }
   0x7   : > { %p42_p0 = scmp.ne.s32.totalorder %s687_s19, %s683_s18  ;;  %p911_p1 = scmp.eq.s32.totalorder %s755_s22, 0 }
   0x8   : > { %p156_p3 = scmp.eq.s32.totalorder %s474_s23, 1  ;;  %p475_p5 = scmp.ge.s32.totalorder %s695_s21, 1 }
   0x9   : > { %p764_p4 = por %p911_p1, %p42_p0  ;;  %p163_p7 = scmp.lt.s32.totalorder %s695_s21, 3 }
   0xa   : > { %p769_p6 = por %p156_p3, %p42_p0  ;;  %s697_s27 = smov [#allocation5]  }
   0xb   : > { %s915_s24 = scalar_select %p764_p4, 1, 0 }
   0xc   : > { %s916_s25 = scalar_select %p769_p6, 1, 0 }
   0xd   : > { %p774_p8 = pnand %p475_p5, %p163_p7  ;;  %s175_s28 = sshll.u32 %s697_s27, 4  ;;  %s176_s28 = int_to_ptr.vmem [resolvable:$true] %s175_s28 }
   0xe   : > { %s788_s30 = sadd.s32 1, %s695_s21   ;;  %s29_s6 = sadd.s32 1, %s691_s20 }
   0xf   : > { %s917_s26 = scalar_select %p774_p8, 1, 0 }
  0x10   : > { %p516_p9 = pneg %p774_p8  ;;  %s26_s7 = ssub.s32 %s695_s21, %s788_s30 }
  0x11   : > { %s584_s8 = scalar_lea.vmem %s176_s28, 512  ;;  %p592_p5 = scmp.lt.s32.totalorder %s176_s28, %s176_s28 }
  0x12   : > { %p783_p11 = pnand %p516_p9, %p911_p1  ;;  %p585_p13 = scmp.ne.s32.totalorder %s176_s28, %s584_s8 }
  0x13   : > { %p593_p7 = scmp.lt.s32.totalorder %s584_s8, %s584_s8 }
  0x14   : > { %p575_p12 = pneg %p783_p11 }
  0x15   : > { %p594_p10 = por %p593_p7, %p592_p5 }
  0x16   : > { %p587_p0 = pnand %p585_p13, %p575_p12 }
  0x18   : > { %p588_p3 = pneg %p587_p0 }
  0x1a   : > { %p595_p2 = pnand %p594_p10, %p588_p3 }
  0x1c   : > { %598 = shalt.err (!%p595_p2)
}
  0x1d   : > { %s698_s9 = smov 128   ;;  %s699_s10 = smov 8  }
  0x1e   : > { %519 = dma.hbm_to_vmem [thread:$0]  (!%p783_p11), %s906_s1, 512, %s176_s28, [#allocation6], %s698_s9, %s698_s9, %s699_s10  }
  0x1f   : > { %p27_p9 = scmp.eq.s32.totalorder %s26_s7, 0  ;;  %p36_p12 = scmp.ne.s32.totalorder %s691_s20, %s687_s19 }
  0x20   : > { %p37_p10 = scmp.eq.s32.totalorder %s695_s21, 0  ;;  %p529_p2 = scmp.lt.s32.totalorder %s695_s21, 2 }
  0x21   : > { %s805_s13 = scalar_select %p27_p9, %s691_s20, %s29_s6  }
  0x22   : > { %p38_p13 = por %p37_p10, %p36_p12  ;;  %p919_p0 = scmp.eq.s32.totalorder %s755_s22, 1 }
  0x23   : > { %s198_s15 = sand.u32 1, %s691_s20   ;;  %s479_s16 = sshll.u32 %s695_s21, 7 }
  0x24   : > { %p809_p3 = por %p919_p0, %p36_p12  ;;  %s478_s17 = sshll.u32 %s198_s15, 3 }
  0x25   : > { %s818_s29 = scalar_lea.hbm %s905_s0, %s479_s16  ;;  %s202_s28 = scalar_lea.vmem [#allocation2], %s478_s17 }
  0x26   : > { %s920_s14 = scalar_select %p809_p3, 1, 0 }
  0x27   : > { %s209_s6 = sshll.u32 %s202_s28, 4  ;;  %p820_p11 = pnand %p529_p2, %p38_p13  ;;  %s210_s6 = int_to_ptr.vmem [resolvable:$true] %s209_s6 }
  0x28   : > { %s199_s8 = scalar_lea.sflag [#allocation3], %s198_s15  ;;  %s599_s9 = scalar_lea.hbm %s818_s29, 128 }
  0x29   : > { %p600_p5 = scmp.ne.s32.totalorder %s818_s29, %s599_s9  ;;  %p601_p7 = pneg %p820_p11 }
  0x2a   : > { %s604_s12 = scalar_lea.hbm %s905_s0, 256  ;;  %p605_p10 = scmp.lt.s32.totalorder %s818_s29, %s905_s0 }
  0x2b   : > { %p602_p9 = pnand %p601_p7, %p600_p5  ;;  %p606_p2 = scmp.lt.s32.totalorder %s604_s12, %s599_s9 }
  0x2d   : > { %p603_p12 = pneg %p602_p9  ;;  %p607_p13 = por %p606_p2, %p605_p10 }
  0x2f   : > { %p608_p0 = pnand %p607_p13, %p603_p12 }
  0x31   : > { %611 = shalt.err (!%p608_p0)
}
  0x32   : > { %s612_s23 = scalar_lea.vmem %s210_s6, 128  ;;  %s700_s15 = smov [#allocation2]  }
  0x33   : > { %p613_p1 = scmp.ne.s32.totalorder %s210_s6, %s612_s23  ;;  %s617_s27 = sshll.u32 %s700_s15, 4  ;;  %s618_s27 = int_to_ptr.vmem [resolvable:$false] %s617_s27 }
  0x34   : > { %s619_s28 = scalar_lea.vmem %s618_s27, 256  ;;  %p620_p5 = scmp.lt.s32.totalorder %s210_s6, %s618_s27 }
  0x35   : > { %p615_p6 = pnand %p613_p1, %p601_p7  ;;  %p621_p9 = scmp.lt.s32.totalorder %s619_s28, %s612_s23 }
  0x37   : > { %p616_p3 = pneg %p615_p6  ;;  %p622_p4 = por %p621_p9, %p620_p5 }
  0x39   : > { %p623_p8 = pnand %p622_p4, %p616_p3 }
  0x3b   : > { %626 = shalt.err (!%p623_p8)
}
  0x3c   : > { %523 = dma.hbm_to_vmem [thread:$0]  (!%p820_p11), %s818_s29, 128, %s210_s6, %s199_s8  }
  0x3d   : > { %p922_p12 = scmp.ne.s32.totalorder %s917_s26, 0 }
  0x3e   : > { %s841_s9 = sand.u32 (!%p922_p12), 1, %s687_s19   ;;  %p923_p1 = scmp.ne.s32.totalorder (!%p922_p12), %s915_s24, 0 }
  0x3f   : > { %218 = sbr.rel (%p922_p12) target bundleno = 623 (0x26f), region = 40  ;;  %s481_s10 = sshll.u32 (!%p922_p12), %s841_s9, 3 }
  0x40   : > { %s221_s11 = scalar_lea.sflag (!%p922_p12), [#allocation3], %s841_s9  ;;  %s224_s12 = scalar_lea.vmem (!%p922_p12), [#allocation2], %s481_s10 }
  0x44   : > { %670 = dma.done.wait (%p923_p1), %s221_s11, 128  }
  0x45   : > { %672 = vsyncadd (%p923_p1), %s221_s11, 4294967168  ;;  %p924_p4 = scmp.eq.s32.totalorder %s755_s22, 0 }
  0x47   : > { %674 = dma.done.wait (%p924_p4), [#allocation6], 512   ;;  %p925_p6 = pmov %p924_p4 }
  0x48   : > { %v701_v0 = vmov 0.0   ;;  %vm702_vm0 = vmmov 0   ;;  %v259_v1 = vld [vmem:[#allocation5 + $0x18] sm:$0xff]  ;;  %v258_v2 = vld [vmem:[#allocation5 + $0x10] sm:$0xff]  ;;  %v257_v3 = vld [vmem:[#allocation5 + $0x8] sm:$0xff]  ;;  %vm267_vm1 = vcmask 261120  }
  0x49   : > { %676 = vsyncadd (%p925_p6), [#allocation6], 4294966784  ;;  %497 = vmatprep.subr.mxu0 %v701_v0  ;;  %505 = vmatprep.mubr.msk.f32.mxu0 %vm702_vm0, %v701_v0  ;;  %v256_v4 = vld [vmem:[#allocation5] sm:$0xff]  ;;  %v255_v5 = vld [vmem:[%s224_s12] sm:$0xff]  ;;  %s489_s16 = sshll.u32 %s755_s22, 7  ;;  %s254_s17 = scalar_lea.vmem [#allocation7], %s481_s10 }
  0x4a   : > { %498 = vmatpush3.msra.mxu0 %v259_v1  ;;  %v484_v6 = vld [vmem:[%s907_s2] ss:$0 sm:$0xff]  ;;  %s394_s23 = sshll.u32 %s254_s17, 4  ;;  %s392_s28 = scalar_lea.hbm %s910_s5, %s489_s16  ;;  %s395_s23 = int_to_ptr.vmem [resolvable:$true] %s394_s23 }
  0x4b   : > { %499 = vmatprep.subr.mxu0 %v701_v0  ;;  %v486_v28 = vld [vmem:[%s908_s3] ss:$0 sm:$0xff]  ;;  %s381_s11 = scalar_lea.sflag [#allocation4], %s841_s9  ;;  %s627_s12 = scalar_lea.vmem %s395_s23, 128 }
  0x4c   : > { %500 = vmatpush3.msra.mxu0 %v258_v2  ;;  %v487_v30 = vld [vmem:[%s909_s4] ss:$0 sm:$0xff]  ;;  %p628_p8 = scmp.ne.s32.totalorder %s395_s23, %s627_s12  ;;  %p926_p3 = scmp.ne.s32.totalorder %s920_s14, 0 }
  0x4d   : > { %501 = vmatprep.subr.mxu0 %v701_v0  ;;  %s703_s24 = smov [#allocation7]  }
  0x4e   : > { %502 = vmatpush3.msra.mxu0 %v257_v3  ;;  %p629_p11 = pnand %p628_p8, %p926_p3  ;;  %s631_s22 = sshll.u32 %s703_s24, 4  ;;  %s632_s22 = int_to_ptr.vmem [resolvable:$false] %s631_s22 }
  0x4f   : > { %503 = vmatprep.subr.mxu0 %v701_v0  ;;  %s633_s10 = scalar_lea.vmem %s632_s22, 256  ;;  %p634_p10 = scmp.lt.s32.totalorder %s395_s23, %s632_s22 }
  0x50   : > { %504 = vmatpush3.msra.mxu0 %v256_v4  ;;  %p630_p7 = pneg %p629_p11  ;;  %p635_p2 = scmp.lt.s32.totalorder %s633_s10, %s627_s12 }
  0x51   : > { %506 = vmatmul.mubr.msk.f32.vlgmr.msra.gmra.mxu0 %vm267_vm1, %v255_v5 }
  0x52   : > { %p636_p13 = por %p635_p2, %p634_p10 }
  0x54   : > { %p637_p0 = pnand %p636_p13, %p630_p7 }
 0x111   : > { %v337_v7 = vpop.f32.mrf.mxu0 }
 0x112   : > { %v338_v8 = vadd.f32 %v484_v6, %v337_v7 }
 0x113   : > { %v507_v9 = vpop.f32.mrf.mxu0 }
 0x114   : > { %v342_v10 = vmul.f32 %v338_v8, %v338_v8  ;;  %v341_v12 = vmul.f32 0.7978846, %v338_v8 }
 0x116   : > { %v343_v11 = vmul.f32 0.044715, %v342_v10 }
 0x118   : > { %v344_v13 = vadd.f32 1.0, %v343_v11 }
 0x11a   : > { %v345_v14 = vmul.f32 %v344_v13, %v341_v12 }
 0x11c   : > { %569 = vtanh.f32 %v345_v14 }
 0x129   : > { %v570_v15 = vpop.eup %569 }
 0x12a   : > { %v347_v16 = vadd.f32 1.0, %v570_v15 }
 0x12c   : > { %v348_v17 = vmul.f32 %v347_v16, %v338_v8 }
 0x12e   : > { %v349_v18 = vsel %vm267_vm1, %v348_v17, 0.0 }
 0x12f   : > { %350 = vadd.xlane.f32.xlu0 %v349_v18 }
 0x1b8   : > { %v351_v19 = vpop.xlane.xlu0 %350 }
 0x1b9   : > { %v353_v20 = vmul.f32 0.03125, %v351_v19 }
 0x1bb   : > { %v354_v21 = vsub.f32 %v348_v17, %v353_v20 }
 0x1bd   : > { %v355_v22 = vmul.f32 %v354_v21, %v354_v21 }
 0x1bf   : > { %v356_v23 = vsel %vm267_vm1, %v355_v22, 0.0 }
 0x1c0   : > { %357 = vadd.xlane.f32.xlu0 %v356_v23 }
 0x249   : > { %v358_v24 = vpop.xlane.xlu0 %357 }
 0x24a   : > { %v359_v25 = vmul.f32 0.03125, %v358_v24 }
 0x24c   : > { %v360_v26 = vadd.f32 4e-12, %v359_v25 }
 0x24e   : > { %571 = vrsqrt.f32 %v360_v26 }
 0x25b   : > { %v572_v27 = vpop.eup %571 }
 0x25c   : > { %v362_v29 = vmul.f32 %v572_v27, %v354_v21 }
 0x25e   : > { %v370_v31 = vmul.f32 %v486_v28, %v362_v29 }
 0x260   : > { %v378_v32 = vadd.f32 %v487_v30, %v370_v31 }
 0x262   : > { %379 = vst.msk [vmem:[%s254_s17] sm:$0xff] %vm267_vm1, %v378_v32 }
 0x263   : > { %640 = shalt.err (!%p637_p0)
}
 0x264   : > { %s641_s26 = scalar_lea.hbm %s392_s28, 128  ;;  %s645_s6 = scalar_lea.hbm %s910_s5, 256 }
 0x265   : > { %p642_p5 = scmp.ne.s32.totalorder %s392_s28, %s641_s26  ;;  %p646_p1 = scmp.lt.s32.totalorder %s392_s28, %s910_s5 }
 0x266   : > { %p647_p4 = scmp.lt.s32.totalorder %s645_s6, %s641_s26 }
 0x267   : > { %p643_p9 = pnand %p642_p5, %p926_p3 }
 0x268   : > { %p648_p6 = por %p647_p4, %p646_p1 }
 0x269   : > { %p644_p12 = pneg %p643_p9 }
 0x26b   : > { %p649_p8 = pnand %p648_p6, %p644_p12 }
 0x26d   : > { %652 = shalt.err (!%p649_p8)
}
 0x26e   : > { %514 = dma.vmem_to_hbm [thread:$0]  (%p926_p3), %s395_s23, 128, %s392_s28, %s381_s11  }
 0x26f PF: > { %s406_s16 = sand.u32 1, %s683_s18   ;;  %p927_p11 = scmp.ne.s32.totalorder %s916_s25, 0 }
 0x270   : > { %p928_p7 = scmp.ge.s32.totalorder %s695_s21, 2  ;;  %s407_s17 = scalar_lea.sflag [#allocation4], %s406_s16 }
 0x272   : > { %p525_p10 = pnand %p928_p7, %p927_p11 }
 0x274   : > { %p526_p2 = pneg %p525_p10 }
 0x276   : > { %678 = dma.done.wait (%p526_p2), %s407_s17, 128  }
 0x277   : > { %680 = vsyncadd (%p526_p2), %s407_s17, 4294967168  ;;  %p19_p13 = scmp.ge.s32.totalorder %s788_s30, 4   ;;  %s929_s18 = smov %s687_s19 }
 0x278   : > { %s930_s19 = smov %s691_s20  ;;  %s931_s20 = smov %s805_s13 }
 0x279   : > { %s932_s21 = smov %s788_s30  ;;  %21 = sbr.rel (!%p19_p13) target bundleno = 6 (0x6), region = 89 }
 0x27e   :  { %412 = vsyncpa [#allocation3], 1 }
 0x27f   :  { %414 = vsyncpa [#allocation3 + $0x1], 1 }
 0x280   :  { %415 = vsyncpa [#allocation6], 1 }
 0x281   :  { %416 = vsyncpa [#allocation4], 1 }
 0x282   :  { %418 = vsyncpa [#allocation4 + $0x1], 1 }

// kernel: tpu_custom_call.1
= control target key start
LH: loop header
LB: loop body
LE: loop exit
PB: predicated region body
PF: predicated region fallthrough
CT: control target
= control target key end

     0   :  { %10 = vsyncpa [#allocation3], 0  ;;  %s905_s0 = inlined_call_operand.hbm [shape: f32[16,32], index: 0, kind: input, shape index: {}]   ;;  %s906_s1 = inlined_call_operand.hbm [shape: f32[32,32], index: 1, kind: input, shape index: {}]   ;;  %s907_s2 = inlined_call_operand.vmem [shape: f32[1,32], index: 2, kind: input, shape index: {}]   ;;  %s908_s3 = inlined_call_operand.vmem [shape: f32[1,32], index: 3, kind: input, shape index: {}]   ;;  %s909_s4 = inlined_call_operand.vmem [shape: f32[1,32], index: 4, kind: input, shape index: {}]   ;;  %s910_s5 = inlined_call_operand.hbm [shape: f32[16,32], index: 5, kind: output, shape index: {}]  }
   0x1   :  { %12 = vsyncpa [#allocation3 + $0x1], 0 }
   0x2   :  { %13 = vsyncpa [#allocation6], 0 }
   0x3   :  { %14 = vsyncpa [#allocation4], 0 }
   0x4   :  { %16 = vsyncpa [#allocation4 + $0x1], 0  ;;  %s734_s18 = smov 0   ;;  %s736_s19 = smov 0  }
   0x5   :  { %s738_s20 = smov 0   ;;  %s740_s21 = smov 0  }
   0x6 LB: > { %s755_s22 = sadd.s32 4294967295, %s695_s21   ;;  %s474_s23 = sadd.s32 4294967294, %s695_s21   ;;  %s695_s21 = sphi %s740_s21, %s932_s21   ;;  %s691_s20 = sphi %s738_s20, %s931_s20   ;;  %s687_s19 = sphi %s736_s19, %s930_s19   ;;  %s683_s18 = sphi %s734_s18, %s929_s18  }
   0x7   : > { %p42_p0 = scmp.ne.s32.totalorder %s687_s19, %s683_s18  ;;  %p911_p1 = scmp.eq.s32.totalorder %s755_s22, 0 }
   0x8   : > { %p156_p3 = scmp.eq.s32.totalorder %s474_s23, 1  ;;  %p475_p5 = scmp.ge.s32.totalorder %s695_s21, 1 }
   0x9   : > { %p764_p4 = por %p911_p1, %p42_p0  ;;  %p163_p7 = scmp.lt.s32.totalorder %s695_s21, 3 }
   0xa   : > { %p769_p6 = por %p156_p3, %p42_p0  ;;  %s697_s27 = smov [#allocation5]  }
   0xb   : > { %s915_s24 = scalar_select %p764_p4, 1, 0 }
   0xc   : > { %s916_s25 = scalar_select %p769_p6, 1, 0 }
   0xd   : > { %p774_p8 = pnand %p475_p5, %p163_p7  ;;  %s175_s28 = sshll.u32 %s697_s27, 4  ;;  %s176_s28 = int_to_ptr.vmem [resolvable:$true] %s175_s28 }
   0xe   : > { %s788_s30 = sadd.s32 1, %s695_s21   ;;  %s29_s6 = sadd.s32 1, %s691_s20 }
   0xf   : > { %s917_s26 = scalar_select %p774_p8, 1, 0 }
  0x10   : > { %p516_p9 = pneg %p774_p8  ;;  %s26_s7 = ssub.s32 %s695_s21, %s788_s30 }
  0x11   : > { %s584_s8 = scalar_lea.vmem %s176_s28, 512  ;;  %p592_p5 = scmp.lt.s32.totalorder %s176_s28, %s176_s28 }
  0x12   : > { %p783_p11 = pnand %p516_p9, %p911_p1  ;;  %p585_p13 = scmp.ne.s32.totalorder %s176_s28, %s584_s8 }
  0x13   : > { %p593_p7 = scmp.lt.s32.totalorder %s584_s8, %s584_s8 }
  0x14   : > { %p575_p12 = pneg %p783_p11 }
  0x15   : > { %p594_p10 = por %p593_p7, %p592_p5 }
  0x16   : > { %p587_p0 = pnand %p585_p13, %p575_p12 }
  0x18   : > { %p588_p3 = pneg %p587_p0 }
  0x1a   : > { %p595_p2 = pnand %p594_p10, %p588_p3 }
  0x1c   : > { %598 = shalt.err (!%p595_p2)
}
  0x1d   : > { %s698_s9 = smov 128   ;;  %s699_s10 = smov 8  }
  0x1e   : > { %519 = dma.hbm_to_vmem [thread:$0]  (!%p783_p11), %s906_s1, 512, %s176_s28, [#allocation6], %s698_s9, %s698_s9, %s699_s10  }
  0x1f   : > { %p27_p9 = scmp.eq.s32.totalorder %s26_s7, 0  ;;  %p36_p12 = scmp.ne.s32.totalorder %s691_s20, %s687_s19 }
  0x20   : > { %p37_p10 = scmp.eq.s32.totalorder %s695_s21, 0  ;;  %p529_p2 = scmp.lt.s32.totalorder %s695_s21, 2 }
  0x21   : > { %s805_s13 = scalar_select %p27_p9, %s691_s20, %s29_s6  }
  0x22   : > { %p38_p13 = por %p37_p10, %p36_p12  ;;  %p919_p0 = scmp.eq.s32.totalorder %s755_s22, 1 }
  0x23   : > { %s198_s15 = sand.u32 1, %s691_s20   ;;  %s479_s16 = sshll.u32 %s695_s21, 7 }
  0x24   : > { %p809_p3 = por %p919_p0, %p36_p12  ;;  %s478_s17 = sshll.u32 %s198_s15, 3 }
  0x25   : > { %s818_s29 = scalar_lea.hbm %s905_s0, %s479_s16  ;;  %s202_s28 = scalar_lea.vmem [#allocation2], %s478_s17 }
  0x26   : > { %s920_s14 = scalar_select %p809_p3, 1, 0 }
  0x27   : > { %s209_s6 = sshll.u32 %s202_s28, 4  ;;  %p820_p11 = pnand %p529_p2, %p38_p13  ;;  %s210_s6 = int_to_ptr.vmem [resolvable:$true] %s209_s6 }
  0x28   : > { %s199_s8 = scalar_lea.sflag [#allocation3], %s198_s15  ;;  %s599_s9 = scalar_lea.hbm %s818_s29, 128 }
  0x29   : > { %p600_p5 = scmp.ne.s32.totalorder %s818_s29, %s599_s9  ;;  %p601_p7 = pneg %p820_p11 }
  0x2a   : > { %s604_s12 = scalar_lea.hbm %s905_s0, 256  ;;  %p605_p10 = scmp.lt.s32.totalorder %s818_s29, %s905_s0 }
  0x2b   : > { %p602_p9 = pnand %p601_p7, %p600_p5  ;;  %p606_p2 = scmp.lt.s32.totalorder %s604_s12, %s599_s9 }
  0x2d   : > { %p603_p12 = pneg %p602_p9  ;;  %p607_p13 = por %p606_p2, %p605_p10 }
  0x2f   : > { %p608_p0 = pnand %p607_p13, %p603_p12 }
  0x31   : > { %611 = shalt.err (!%p608_p0)
}
  0x32   : > { %s612_s23 = scalar_lea.vmem %s210_s6, 128  ;;  %s700_s15 = smov [#allocation2]  }
  0x33   : > { %p613_p1 = scmp.ne.s32.totalorder %s210_s6, %s612_s23  ;;  %s617_s27 = sshll.u32 %s700_s15, 4  ;;  %s618_s27 = int_to_ptr.vmem [resolvable:$false] %s617_s27 }
  0x34   : > { %s619_s28 = scalar_lea.vmem %s618_s27, 256  ;;  %p620_p5 = scmp.lt.s32.totalorder %s210_s6, %s618_s27 }
  0x35   : > { %p615_p6 = pnand %p613_p1, %p601_p7  ;;  %p621_p9 = scmp.lt.s32.totalorder %s619_s28, %s612_s23 }
  0x37   : > { %p616_p3 = pneg %p615_p6  ;;  %p622_p4 = por %p621_p9, %p620_p5 }
  0x39   : > { %p623_p8 = pnand %p622_p4, %p616_p3 }
  0x3b   : > { %626 = shalt.err (!%p623_p8)
}
  0x3c   : > { %523 = dma.hbm_to_vmem [thread:$0]  (!%p820_p11), %s818_s29, 128, %s210_s6, %s199_s8  }
  0x3d   : > { %p922_p12 = scmp.ne.s32.totalorder %s917_s26, 0 }
  0x3e   : > { %s841_s9 = sand.u32 (!%p922_p12), 1, %s687_s19   ;;  %p923_p1 = scmp.ne.s32.totalorder (!%p922_p12), %s915_s24, 0 }
  0x3f   : > { %218 = sbr.rel (%p922_p12) target bundleno = 623 (0x26f), region = 40  ;;  %s481_s10 = sshll.u32 (!%p922_p12), %s841_s9, 3 }
  0x40   : > { %s221_s11 = scalar_lea.sflag (!%p922_p12), [#allocation3], %s841_s9  ;;  %s224_s12 = scalar_lea.vmem (!%p922_p12), [#allocation2], %s481_s10 }
  0x44   : > { %670 = dma.done.wait (%p923_p1), %s221_s11, 128  }
  0x45   : > { %672 = vsyncadd (%p923_p1), %s221_s11, 4294967168  ;;  %p924_p4 = scmp.eq.s32.totalorder %s755_s22, 0 }
  0x47   : > { %674 = dma.done.wait (%p924_p4), [#allocation6], 512   ;;  %p925_p6 = pmov %p924_p4 }
  0x48   : > { %v701_v0 = vmov 0.0   ;;  %vm702_vm0 = vmmov 0   ;;  %v259_v1 = vld [vmem:[#allocation5 + $0x18] sm:$0xff]  ;;  %v258_v2 = vld [vmem:[#allocation5 + $0x10] sm:$0xff]  ;;  %v257_v3 = vld [vmem:[#allocation5 + $0x8] sm:$0xff]  ;;  %vm267_vm1 = vcmask 261120  }
  0x49   : > { %676 = vsyncadd (%p925_p6), [#allocation6], 4294966784  ;;  %497 = vmatprep.subr.mxu0 %v701_v0  ;;  %505 = vmatprep.mubr.msk.f32.mxu0 %vm702_vm0, %v701_v0  ;;  %v256_v4 = vld [vmem:[#allocation5] sm:$0xff]  ;;  %v255_v5 = vld [vmem:[%s224_s12] sm:$0xff]  ;;  %s489_s16 = sshll.u32 %s755_s22, 7  ;;  %s254_s17 = scalar_lea.vmem [#allocation7], %s481_s10 }
  0x4a   : > { %498 = vmatpush3.msra.mxu0 %v259_v1  ;;  %v484_v6 = vld [vmem:[%s907_s2] ss:$0 sm:$0xff]  ;;  %s394_s23 = sshll.u32 %s254_s17, 4  ;;  %s392_s28 = scalar_lea.hbm %s910_s5, %s489_s16  ;;  %s395_s23 = int_to_ptr.vmem [resolvable:$true] %s394_s23 }
  0x4b   : > { %499 = vmatprep.subr.mxu0 %v701_v0  ;;  %v486_v28 = vld [vmem:[%s908_s3] ss:$0 sm:$0xff]  ;;  %s381_s11 = scalar_lea.sflag [#allocation4], %s841_s9  ;;  %s627_s12 = scalar_lea.vmem %s395_s23, 128 }
  0x4c   : > { %500 = vmatpush3.msra.mxu0 %v258_v2  ;;  %v487_v30 = vld [vmem:[%s909_s4] ss:$0 sm:$0xff]  ;;  %p628_p8 = scmp.ne.s32.totalorder %s395_s23, %s627_s12  ;;  %p926_p3 = scmp.ne.s32.totalorder %s920_s14, 0 }
  0x4d   : > { %501 = vmatprep.subr.mxu0 %v701_v0  ;;  %s703_s24 = smov [#allocation7]  }
  0x4e   : > { %502 = vmatpush3.msra.mxu0 %v257_v3  ;;  %p629_p11 = pnand %p628_p8, %p926_p3  ;;  %s631_s22 = sshll.u32 %s703_s24, 4  ;;  %s632_s22 = int_to_ptr.vmem [resolvable:$false] %s631_s22 }
  0x4f   : > { %503 = vmatprep.subr.mxu0 %v701_v0  ;;  %s633_s10 = scalar_lea.vmem %s632_s22, 256  ;;  %p634_p10 = scmp.lt.s32.totalorder %s395_s23, %s632_s22 }
  0x50   : > { %504 = vmatpush3.msra.mxu0 %v256_v4  ;;  %p630_p7 = pneg %p629_p11  ;;  %p635_p2 = scmp.lt.s32.totalorder %s633_s10, %s627_s12 }
  0x51   : > { %506 = vmatmul.mubr.msk.f32.vlgmr.msra.gmra.mxu0 %vm267_vm1, %v255_v5 }
  0x52   : > { %p636_p13 = por %p635_p2, %p634_p10 }
  0x54   : > { %p637_p0 = pnand %p636_p13, %p630_p7 }
 0x111   : > { %v337_v7 = vpop.f32.mrf.mxu0 }
 0x112   : > { %v338_v8 = vadd.f32 %v484_v6, %v337_v7 }
 0x113   : > { %v507_v9 = vpop.f32.mrf.mxu0 }
 0x114   : > { %v342_v10 = vmul.f32 %v338_v8, %v338_v8  ;;  %v341_v12 = vmul.f32 0.7978846, %v338_v8 }
 0x116   : > { %v343_v11 = vmul.f32 0.044715, %v342_v10 }
 0x118   : > { %v344_v13 = vadd.f32 1.0, %v343_v11 }
 0x11a   : > { %v345_v14 = vmul.f32 %v344_v13, %v341_v12 }
 0x11c   : > { %569 = vtanh.f32 %v345_v14 }
 0x129   : > { %v570_v15 = vpop.eup %569 }
 0x12a   : > { %v347_v16 = vadd.f32 1.0, %v570_v15 }
 0x12c   : > { %v348_v17 = vmul.f32 %v347_v16, %v338_v8 }
 0x12e   : > { %v349_v18 = vsel %vm267_vm1, %v348_v17, 0.0 }
 0x12f   : > { %350 = vadd.xlane.f32.xlu0 %v349_v18 }
 0x1b8   : > { %v351_v19 = vpop.xlane.xlu0 %350 }
 0x1b9   : > { %v353_v20 = vmul.f32 0.03125, %v351_v19 }
 0x1bb   : > { %v354_v21 = vsub.f32 %v348_v17, %v353_v20 }
 0x1bd   : > { %v355_v22 = vmul.f32 %v354_v21, %v354_v21 }
 0x1bf   : > { %v356_v23 = vsel %vm267_vm1, %v355_v22, 0.0 }
 0x1c0   : > { %357 = vadd.xlane.f32.xlu0 %v356_v23 }
 0x249   : > { %v358_v24 = vpop.xlane.xlu0 %357 }
 0x24a   : > { %v359_v25 = vmul.f32 0.03125, %v358_v24 }
 0x24c   : > { %v360_v26 = vadd.f32 4e-12, %v359_v25 }
 0x24e   : > { %571 = vrsqrt.f32 %v360_v26 }
 0x25b   : > { %v572_v27 = vpop.eup %571 }
 0x25c   : > { %v362_v29 = vmul.f32 %v572_v27, %v354_v21 }
 0x25e   : > { %v370_v31 = vmul.f32 %v486_v28, %v362_v29 }
 0x260   : > { %v378_v32 = vadd.f32 %v487_v30, %v370_v31 }
 0x262   : > { %379 = vst.msk [vmem:[%s254_s17] sm:$0xff] %vm267_vm1, %v378_v32 }
 0x263   : > { %640 = shalt.err (!%p637_p0)
}
 0x264   : > { %s641_s26 = scalar_lea.hbm %s392_s28, 128  ;;  %s645_s6 = scalar_lea.hbm %s910_s5, 256 }
 0x265   : > { %p642_p5 = scmp.ne.s32.totalorder %s392_s28, %s641_s26  ;;  %p646_p1 = scmp.lt.s32.totalorder %s392_s28, %s910_s5 }
 0x266   : > { %p647_p4 = scmp.lt.s32.totalorder %s645_s6, %s641_s26 }
 0x267   : > { %p643_p9 = pnand %p642_p5, %p926_p3 }
 0x268   : > { %p648_p6 = por %p647_p4, %p646_p1 }
 0x269   : > { %p644_p12 = pneg %p643_p9 }
 0x26b   : > { %p649_p8 = pnand %p648_p6, %p644_p12 }
 0x26d   : > { %652 = shalt.err (!%p649_p8)
}
 0x26e   : > { %514 = dma.vmem_to_hbm [thread:$0]  (%p926_p3), %s395_s23, 128, %s392_s28, %s381_s11  }
 0x26f PF: > { %s406_s16 = sand.u32 1, %s683_s18   ;;  %p927_p11 = scmp.ne.s32.totalorder %s916_s25, 0 }
 0x270   : > { %p928_p7 = scmp.ge.s32.totalorder %s695_s21, 2  ;;  %s407_s17 = scalar_lea.sflag [#allocation4], %s406_s16 }
 0x272   : > { %p525_p10 = pnand %p928_p7, %p927_p11 }
 0x274   : > { %p526_p2 = pneg %p525_p10 }
 0x276   : > { %678 = dma.done.wait (%p526_p2), %s407_s17, 128  }
 0x277   : > { %680 = vsyncadd (%p526_p2), %s407_s17, 4294967168  ;;  %p19_p13 = scmp.ge.s32.totalorder %s788_s30, 4   ;;  %s929_s18 = smov %s687_s19 }
 0x278   : > { %s930_s19 = smov %s691_s20  ;;  %s931_s20 = smov %s805_s13 }
 0x279   : > { %s932_s21 = smov %s788_s30  ;;  %21 = sbr.rel (!%p19_p13) target bundleno = 6 (0x6), region = 89 }
 0x27e   :  { %412 = vsyncpa [#allocation3], 1 }
 0x27f   :  { %414 = vsyncpa [#allocation3 + $0x1], 1 }
 0x280   :  { %415 = vsyncpa [#allocation6], 1 }
 0x281   :  { %416 = vsyncpa [#allocation4], 1 }
 0x282   :  { %418 = vsyncpa [#allocation4 + $0x1], 1 }

</bundles_post_ra>
